<compile_context>
chip_gen: v7x
topology: tpu7x:2x2x1
jax: 0.10.0
libtpu: 0.0.40
codegen_flags: <defaults>
</compile_context>

<pallas_src>
import jax
import jax.numpy as jnp
from jax.experimental import pallas as pl
from jax.experimental.pallas import tpu as pltpu


# ----------------------------- configuration ------------------------------
NUM_EMBEDDINGS = [10, 20, 30, 40]          # vocab sizes of the 4 sparse feats
EMBEDDING_DIM = 8                          # D
N_DENSE_FEATS = 3                          # len(dense_features)
N_SPARSE = len(NUM_EMBEDDINGS)             # 4
NUME_FEA_SIZE = N_DENSE_FEATS + 1          # dense slice width = 4
HIDDEN_UNITS = [32, 16]
DNN_IN_DIM = NUME_FEA_SIZE + N_SPARSE * EMBEDDING_DIM   # 36
FINAL_OUT = 10
BATCH = 8
BATCH_TILE = 256                           # max rows per grid step

VOCAB_OFFSETS = [0, 10, 30, 60]            # cumulative vocab offsets
TOT_VOCAB = sum(NUM_EMBEDDINGS)            # 100
TOT_PAD = 128                              # table K dim (one MXU K-pass on v5e)
DENSE_ROW = TOT_PAD - NUME_FEA_SIZE        # dense features live in rows 124:128

# ---- packed parameter slab layout (P_ROWS x 128, f32) ----------------------
# rows   0:128  fused gather table T (see columns below)
# rows 128:256  W2 zero-padded to 128x128 (nonzero block [0:32, 0:16])
# rows 256:384  Wf zero-padded to 128x128 (nonzero block [0:16, 0:10])
# rows 384:392  tail: 384 b1(pad128), 385 b2(pad128), 386 bf+bd(pad128),
#                     387 qa (quadratic FM coeffs), 388 qb (linear FM coeffs)
# table T columns: 0:32 fused W1 contribution, 32:40 sum_embed block,
#                  40 fm 1st-order, 41 ||emb2||^2
P_COLS = 128
GT_R, W2_R, WF_R, TAIL_R = 0, 128, 256, 384
P_ROWS = 392
H1_C, SUM_C, FM1_C, SQ_C = 0, 32, 40, 41


# ------------------------------- kernel -----------------------------------
def deepfm_kernel(x_ref, p_ref, out_ref):
    x = x_ref[...]                                       # (Bt, 8)
    bt = x.shape[0]
    dense = x[:, :NUME_FEA_SIZE]                         # (Bt, 4)
    idx = x[:, NUME_FEA_SIZE:].astype(jnp.int32)         # (Bt, 4) pre-offset ids

    # ---- multi-hot (+ dense values in lanes 124:128) ----------------------
    iota = jax.lax.broadcasted_iota(jnp.int32, (bt, TOT_PAD), 1)
    mh = (iota == idx[:, 0:1]).astype(jnp.float32)
    for s in range(1, N_SPARSE):                         # static tiny loop
        mh = mh + (iota == idx[:, s:s + 1]).astype(jnp.float32)
    for d in range(NUME_FEA_SIZE):
        mh = mh + jnp.where(iota == (DENSE_ROW + d), dense[:, d:d + 1], 0.0)

    # ---- single fused gather / first-layer / FM matmul ---------------------
    g = jnp.dot(mh, p_ref[GT_R:GT_R + TOT_PAD, :],
                preferred_element_type=jnp.float32)      # (Bt, 128)

    tail = p_ref[TAIL_R:TAIL_R + 8, :]                   # aligned (8,128) load
    b1 = tail[0:1, :]
    b2 = tail[1:2, :]
    bf = tail[2:3, :]                                    # bf (+ bd folded in)
    qa = tail[3:4, :]
    qb = tail[4:5, :]

    # ---- FM 1st + 2nd order: single lane reduce ----------------------------
    fm = jnp.sum(qa * g * g + qb * g, axis=1, keepdims=True)   # (Bt, 1)

    # ---- DNN (everything 128-lane dense; padded rows/cols are zero) --------
    h = jnp.maximum(g + b1, 0.0)                         # lanes >=32 killed by W2 pad
    h = jnp.dot(h, p_ref[W2_R:W2_R + 128, :],
                preferred_element_type=jnp.float32) + b2
    h = jnp.maximum(h, 0.0)
    dnn = jnp.dot(h, p_ref[WF_R:WF_R + 128, :],
                  preferred_element_type=jnp.float32) + bf     # (Bt, 128)

    out_ref[...] = dnn + fm                              # fm broadcast over lanes


# ------------------------------ wrapper ------------------------------------
def _round_up(v, m):
    return ((v + m - 1) // m) * m


def deepfm_pallas(target_x, pslab):
    """target_x: (B, 8) [dense(4) | sparse ids (4)]; pslab: packed (392,128) f32."""
    b = target_x.shape[0]
    dense = target_x[:, :NUME_FEA_SIZE].astype(jnp.float32)
    ids = target_x[:, NUME_FEA_SIZE:].astype(jnp.int32)
    ids = jnp.clip(ids, 0, jnp.asarray([v - 1 for v in NUM_EMBEDDINGS], jnp.int32))
    ids = ids + jnp.asarray(VOCAB_OFFSETS, jnp.int32)    # pre-offset in wrapper
    x = jnp.concatenate([dense, ids.astype(jnp.float32)], axis=1)

    # batch tiling: big tiles, and >=2 grid steps when possible (v7x megacore)
    b8 = _round_up(b, 8)
    if b8 <= 8:
        bt = 8
    elif b8 >= 2 * BATCH_TILE:
        bt = BATCH_TILE
    else:
        bt = _round_up((b8 + 1) // 2, 8)
    b_pad = _round_up(b8, bt)
    if b_pad != b:
        x = jnp.pad(x, ((0, b_pad - b), (0, 0)))

    flops = 2 * b_pad * (TOT_PAD * P_COLS * 3)
    bytes_accessed = (x.size + pslab.size + b_pad * P_COLS) * 4

    out = pl.pallas_call(
        deepfm_kernel,
        out_shape=jax.ShapeDtypeStruct((b_pad, P_COLS), jnp.float32),
        grid=(b_pad // bt,),
        in_specs=[
            pl.BlockSpec((bt, NUME_FEA_SIZE + N_SPARSE), lambda i: (i, 0)),
            pl.BlockSpec((P_ROWS, P_COLS), lambda i: (0, 0)),   # loaded once
        ],
        out_specs=pl.BlockSpec((bt, P_COLS), lambda i: (i, 0)),
        compiler_params=pltpu.CompilerParams(
            dimension_semantics=("parallel",)),
        cost_estimate=pl.CostEstimate(flops=flops, transcendentals=0,
                                      bytes_accessed=bytes_accessed),
    )(x, pslab)
    return out[:b, :FINAL_OUT]


# ------------------------------ glue / init --------------------------------
def init_params(key):
    """Deterministic init (nn.Linear stored as (in, out); biases as (1, out))."""
    ks = jax.random.split(key, 16)
    p = {}
    p["wd"] = 0.1 * jax.random.normal(ks[0], (NUME_FEA_SIZE, 1), jnp.float32)
    p["bd"] = 0.1 * jax.random.normal(ks[1], (1, 1), jnp.float32)
    p["emb1"] = [0.1 * jax.random.normal(ks[2 + i], (voc, 1), jnp.float32)
                 for i, voc in enumerate(NUM_EMBEDDINGS)]
    p["emb2"] = [0.1 * jax.random.normal(ks[6 + i], (voc, EMBEDDING_DIM), jnp.float32)
                 for i, voc in enumerate(NUM_EMBEDDINGS)]
    p["w1"] = 0.1 * jax.random.normal(ks[10], (DNN_IN_DIM, HIDDEN_UNITS[0]), jnp.float32)
    p["b1"] = 0.1 * jax.random.normal(ks[11], (1, HIDDEN_UNITS[0]), jnp.float32)
    p["w2"] = 0.1 * jax.random.normal(ks[12], (HIDDEN_UNITS[0], HIDDEN_UNITS[1]), jnp.float32)
    p["b2"] = 0.1 * jax.random.normal(ks[13], (1, HIDDEN_UNITS[1]), jnp.float32)
    p["wf"] = 0.1 * jax.random.normal(ks[14], (HIDDEN_UNITS[1], FINAL_OUT), jnp.float32)
    p["bf"] = 0.1 * jax.random.normal(ks[15], (1, FINAL_OUT), jnp.float32)
    return p


def pack_params(p):
    """Pack embeddings, FM helpers and all Linear weights into one (392,128) slab."""
    slab = jnp.zeros((P_ROWS, P_COLS), jnp.float32)
    w1 = p["w1"]                                          # (36, 32)
    for s, voc in enumerate(NUM_EMBEDDINGS):
        off = VOCAB_OFFSETS[s]
        e2 = p["emb2"][s]                                 # (voc, 8)
        # fused first DNN layer: emb2_s[j] @ W1[8s:8s+8, :]
        slab = slab.at[GT_R + off:GT_R + off + voc, H1_C:H1_C + HIDDEN_UNITS[0]].set(
            e2 @ w1[s * EMBEDDING_DIM:(s + 1) * EMBEDDING_DIM, :])
        # shared sum_embed block, fm 1st-order column, squared-norm column
        slab = slab.at[GT_R + off:GT_R + off + voc, SUM_C:SUM_C + EMBEDDING_DIM].set(e2)
        slab = slab.at[GT_R + off:GT_R + off + voc, FM1_C].set(p["emb1"][s][:, 0])
        slab = slab.at[GT_R + off:GT_R + off + voc, SQ_C].set(jnp.sum(e2 * e2, axis=1))
    # dense features ride in the spare vocab-pad rows 124:128
    slab = slab.at[GT_R + DENSE_ROW:GT_R + TOT_PAD, H1_C:H1_C + HIDDEN_UNITS[0]].set(
        w1[N_SPARSE * EMBEDDING_DIM:, :])
    slab = slab.at[GT_R + DENSE_ROW:GT_R + TOT_PAD, FM1_C].set(p["wd"][:, 0])
    # W2 / Wf zero-padded to 128x128
    slab = slab.at[W2_R:W2_R + HIDDEN_UNITS[0], :HIDDEN_UNITS[1]].set(p["w2"])
    slab = slab.at[WF_R:WF_R + HIDDEN_UNITS[1], :FINAL_OUT].set(p["wf"])
    # tail: biases (bd folded into bf) and FM coefficient rows
    slab = slab.at[TAIL_R + 0, :HIDDEN_UNITS[0]].set(p["b1"][0])
    slab = slab.at[TAIL_R + 1, :HIDDEN_UNITS[1]].set(p["b2"][0])
    slab = slab.at[TAIL_R + 2, :FINAL_OUT].set(p["bf"][0] + p["bd"][0, 0])
    qa = jnp.zeros((P_COLS,), jnp.float32).at[SUM_C:SUM_C + EMBEDDING_DIM].set(0.5)
    qb = (jnp.zeros((P_COLS,), jnp.float32).at[FM1_C].set(1.0).at[SQ_C].set(-0.5))
    slab = slab.at[TAIL_R + 3, :].set(qa)
    slab = slab.at[TAIL_R + 4, :].set(qb)
    return slab


def deepfm_reference(target_x, params):
    """Pure-JAX reference mirroring the PyTorch forward, for a sanity check."""
    dense_input = target_x[:, :NUME_FEA_SIZE].astype(jnp.float32)
    sparse_inputs = target_x[:, NUME_FEA_SIZE:].astype(jnp.int32)
    fm_1st_sparse = sum(params["emb1"][i][sparse_inputs[:, i]]
                        for i in range(N_SPARSE))
    fm_1st_dense = dense_input @ params["wd"] + params["bd"]
    fm_1st = fm_1st_sparse + fm_1st_dense
    emb2 = jnp.stack([params["emb2"][i][sparse_inputs[:, i]]
                      for i in range(N_SPARSE)], axis=1)          # (B,S,D)
    sum_embed = jnp.sum(emb2, axis=1)
    fm_2nd = 0.5 * jnp.sum(sum_embed ** 2 - jnp.sum(emb2 ** 2, axis=1),
                           axis=1, keepdims=True)
    x = jnp.concatenate([emb2.reshape(emb2.shape[0], -1), dense_input], axis=-1)
    h = jnp.maximum(x @ params["w1"] + params["b1"], 0.0)
    h = jnp.maximum(h @ params["w2"] + params["b2"], 0.0)
    dnn_out = h @ params["wf"] + params["bf"]
    return fm_1st + fm_2nd + dnn_out


# --------------------------------- main ------------------------------------
if __name__ == "__main__":
    key = jax.random.PRNGKey(0)
    k_par, k_dense, k_sparse = jax.random.split(key, 3)

    params = init_params(k_par)
    pslab = pack_params(params)

    # target_x = [dense (B,4 floats) | sparse indices (B,4) stored as float]
    dense_part = jax.random.normal(k_dense, (BATCH, NUME_FEA_SIZE), jnp.float32)
    sparse_idx = jnp.stack(
        [jax.random.randint(jax.random.fold_in(k_sparse, i), (BATCH,), 0, voc)
         for i, voc in enumerate(NUM_EMBEDDINGS)], axis=1).astype(jnp.float32)
    target_x = jnp.concatenate([dense_part, sparse_idx], axis=1)   # (B, 8)

    out = jax.block_until_ready(deepfm_pallas(target_x, pslab))
    ref = jax.block_until_ready(deepfm_reference(target_x, params))

    assert out.shape == (BATCH, FINAL_OUT)
    assert jnp.allclose(out, ref, rtol=1e-2, atol=2e-3), "mismatch vs JAX reference"

    print("KERNEL_OK")
</pallas_src>

<mosaic_0001>
module attributes {stable_mosaic.version = 11 : i64} {
  func.func @deepfm_kernel(%arg0: i32, %arg1: memref<8x8xf32, #tpu.memory_space<vmem>>, %arg2: memref<392x128xf32, #tpu.memory_space<vmem>>, %arg3: memref<8x128xf32, #tpu.memory_space<vmem>>) attributes {dimension_semantics = [#tpu.dimension_semantics<parallel>], iteration_bounds = array<i64: 1>, scalar_prefetch = 0 : i64, scratch_operands = 0 : i64, tpu.core_type = #tpu.core_type<tc>, window_params = [{transform_indices = @transform_0, window_bounds = array<i64: 8, 8>}, {pipeline_mode = #tpu.pipeline_mode<synchronous>, transform_indices = @transform_1, window_bounds = array<i64: 392, 128>}, {transform_indices = @transform_2, window_bounds = array<i64: 8, 128>}]} {
    %c0 = arith.constant 0 : index
    %c0_0 = arith.constant 0 : index
    %0 = vector.load %arg1[%c0, %c0_0] : memref<8x8xf32, #tpu.memory_space<vmem>>, vector<8x8xf32>
    %1 = vector.extract_strided_slice %0 {offsets = [0, 0], sizes = [8, 4], strides = [1, 1]} : vector<8x8xf32> to vector<8x4xf32>
    %2 = vector.extract_strided_slice %0 {offsets = [0, 4], sizes = [8, 4], strides = [1, 1]} : vector<8x8xf32> to vector<8x4xf32>
    %3 = arith.fptosi %2 : vector<8x4xf32> to vector<8x4xi32>
    %4 = tpu.iota {dimensions = array<i32: 1>} : vector<8x128xi32>
    %5 = vector.extract_strided_slice %3 {offsets = [0, 0], sizes = [8, 1], strides = [1, 1]} : vector<8x4xi32> to vector<8x1xi32>
    %6 = vector.broadcast %5 : vector<8x1xi32> to vector<8x128xi32>
    %7 = arith.cmpi eq, %4, %6 : vector<8x128xi32>
    %8 = arith.extui %7 : vector<8x128xi1> to vector<8x128xi32>
    %9 = arith.sitofp %8 : vector<8x128xi32> to vector<8x128xf32>
    %10 = vector.extract_strided_slice %3 {offsets = [0, 1], sizes = [8, 1], strides = [1, 1]} : vector<8x4xi32> to vector<8x1xi32>
    %11 = vector.broadcast %10 : vector<8x1xi32> to vector<8x128xi32>
    %12 = arith.cmpi eq, %4, %11 : vector<8x128xi32>
    %13 = arith.extui %12 : vector<8x128xi1> to vector<8x128xi32>
    %14 = arith.sitofp %13 : vector<8x128xi32> to vector<8x128xf32>
    %15 = arith.addf %9, %14 : vector<8x128xf32>
    %16 = vector.extract_strided_slice %3 {offsets = [0, 2], sizes = [8, 1], strides = [1, 1]} : vector<8x4xi32> to vector<8x1xi32>
    %17 = vector.broadcast %16 : vector<8x1xi32> to vector<8x128xi32>
    %18 = arith.cmpi eq, %4, %17 : vector<8x128xi32>
    %19 = arith.extui %18 : vector<8x128xi1> to vector<8x128xi32>
    %20 = arith.sitofp %19 : vector<8x128xi32> to vector<8x128xf32>
    %21 = arith.addf %15, %20 : vector<8x128xf32>
    %22 = vector.extract_strided_slice %3 {offsets = [0, 3], sizes = [8, 1], strides = [1, 1]} : vector<8x4xi32> to vector<8x1xi32>
    %23 = vector.broadcast %22 : vector<8x1xi32> to vector<8x128xi32>
    %24 = arith.cmpi eq, %4, %23 : vector<8x128xi32>
    %25 = arith.extui %24 : vector<8x128xi1> to vector<8x128xi32>
    %26 = arith.sitofp %25 : vector<8x128xi32> to vector<8x128xf32>
    %27 = arith.addf %21, %26 : vector<8x128xf32>
    %c124_i32 = arith.constant 124 : i32
    %28 = vector.broadcast %c124_i32 : i32 to vector<8x128xi32>
    %29 = arith.cmpi eq, %4, %28 : vector<8x128xi32>
    %30 = vector.extract_strided_slice %1 {offsets = [0, 0], sizes = [8, 1], strides = [1, 1]} : vector<8x4xf32> to vector<8x1xf32>
    %cst = arith.constant 0.000000e+00 : f32
    %31 = vector.shape_cast %30 : vector<8x1xf32> to vector<8x1xf32>
    %32 = vector.broadcast %31 : vector<8x1xf32> to vector<8x128xf32>
    %33 = vector.broadcast %cst : f32 to vector<8x128xf32>
    %34 = arith.select %29, %32, %33 : vector<8x128xi1>, vector<8x128xf32>
    %35 = arith.addf %27, %34 : vector<8x128xf32>
    %c125_i32 = arith.constant 125 : i32
    %36 = vector.broadcast %c125_i32 : i32 to vector<8x128xi32>
    %37 = arith.cmpi eq, %4, %36 : vector<8x128xi32>
    %38 = vector.extract_strided_slice %1 {offsets = [0, 1], sizes = [8, 1], strides = [1, 1]} : vector<8x4xf32> to vector<8x1xf32>
    %cst_1 = arith.constant 0.000000e+00 : f32
    %39 = vector.shape_cast %38 : vector<8x1xf32> to vector<8x1xf32>
    %40 = vector.broadcast %39 : vector<8x1xf32> to vector<8x128xf32>
    %41 = vector.broadcast %cst_1 : f32 to vector<8x128xf32>
    %42 = arith.select %37, %40, %41 : vector<8x128xi1>, vector<8x128xf32>
    %43 = arith.addf %35, %42 : vector<8x128xf32>
    %c126_i32 = arith.constant 126 : i32
    %44 = vector.broadcast %c126_i32 : i32 to vector<8x128xi32>
    %45 = arith.cmpi eq, %4, %44 : vector<8x128xi32>
    %46 = vector.extract_strided_slice %1 {offsets = [0, 2], sizes = [8, 1], strides = [1, 1]} : vector<8x4xf32> to vector<8x1xf32>
    %cst_2 = arith.constant 0.000000e+00 : f32
    %47 = vector.shape_cast %46 : vector<8x1xf32> to vector<8x1xf32>
    %48 = vector.broadcast %47 : vector<8x1xf32> to vector<8x128xf32>
    %49 = vector.broadcast %cst_2 : f32 to vector<8x128xf32>
    %50 = arith.select %45, %48, %49 : vector<8x128xi1>, vector<8x128xf32>
    %51 = arith.addf %43, %50 : vector<8x128xf32>
    %c127_i32 = arith.constant 127 : i32
    %52 = vector.broadcast %c127_i32 : i32 to vector<8x128xi32>
    %53 = arith.cmpi eq, %4, %52 : vector<8x128xi32>
    %54 = vector.extract_strided_slice %1 {offsets = [0, 3], sizes = [8, 1], strides = [1, 1]} : vector<8x4xf32> to vector<8x1xf32>
    %cst_3 = arith.constant 0.000000e+00 : f32
    %55 = vector.shape_cast %54 : vector<8x1xf32> to vector<8x1xf32>
    %56 = vector.broadcast %55 : vector<8x1xf32> to vector<8x128xf32>
    %57 = vector.broadcast %cst_3 : f32 to vector<8x128xf32>
    %58 = arith.select %53, %56, %57 : vector<8x128xi1>, vector<8x128xf32>
    %59 = arith.addf %51, %58 : vector<8x128xf32>
    %c0_4 = arith.constant 0 : index
    %c0_5 = arith.constant 0 : index
    %60 = vector.load %arg2[%c0_4, %c0_5] : memref<392x128xf32, #tpu.memory_space<vmem>>, vector<128x128xf32>
    %cst_6 = arith.constant dense<0.000000e+00> : vector<8x128xf32>
    %61 = tpu.matmul %59, %60, %cst_6 {dimension_numbers = #tpu.dot_dimension_numbers<[1], [0], [0], [1], [0, 0, 1, 1], [], []>} : vector<8x128xf32>, vector<128x128xf32>, vector<8x128xf32> -> vector<8x128xf32>
    %c384 = arith.constant 384 : index
    %c0_7 = arith.constant 0 : index
    %62 = vector.load %arg2[%c384, %c0_7] : memref<392x128xf32, #tpu.memory_space<vmem>>, vector<8x128xf32>
    %63 = vector.extract_strided_slice %62 {offsets = [0, 0], sizes = [1, 128], strides = [1, 1]} : vector<8x128xf32> to vector<1x128xf32>
    %64 = vector.extract_strided_slice %62 {offsets = [1, 0], sizes = [1, 128], strides = [1, 1]} : vector<8x128xf32> to vector<1x128xf32>
    %65 = vector.extract_strided_slice %62 {offsets = [2, 0], sizes = [1, 128], strides = [1, 1]} : vector<8x128xf32> to vector<1x128xf32>
    %66 = vector.extract_strided_slice %62 {offsets = [3, 0], sizes = [1, 128], strides = [1, 1]} : vector<8x128xf32> to vector<1x128xf32>
    %67 = vector.extract_strided_slice %62 {offsets = [4, 0], sizes = [1, 128], strides = [1, 1]} : vector<8x128xf32> to vector<1x128xf32>
    %68 = vector.broadcast %66 : vector<1x128xf32> to vector<8x128xf32>
    %69 = arith.mulf %68, %61 : vector<8x128xf32>
    %70 = arith.mulf %69, %61 : vector<8x128xf32>
    %71 = vector.broadcast %67 : vector<1x128xf32> to vector<8x128xf32>
    %72 = arith.mulf %71, %61 : vector<8x128xf32>
    %73 = arith.addf %70, %72 : vector<8x128xf32>
    %cst_8 = arith.constant dense<0.000000e+00> : vector<8xf32>
    %74 = vector.multi_reduction <add>, %73, %cst_8 [1] : vector<8x128xf32> to vector<8xf32>
    %75 = vector.shape_cast %74 : vector<8xf32> to vector<8x1xf32>
    %76 = vector.broadcast %63 : vector<1x128xf32> to vector<8x128xf32>
    %77 = arith.addf %61, %76 : vector<8x128xf32>
    %cst_9 = arith.constant 0.000000e+00 : f32
    %78 = vector.broadcast %cst_9 : f32 to vector<8x128xf32>
    %79 = arith.maximumf %77, %78 : vector<8x128xf32>
    %c128 = arith.constant 128 : index
    %c0_10 = arith.constant 0 : index
    %80 = vector.load %arg2[%c128, %c0_10] : memref<392x128xf32, #tpu.memory_space<vmem>>, vector<128x128xf32>
    %cst_11 = arith.constant dense<0.000000e+00> : vector<8x128xf32>
    %81 = tpu.matmul %79, %80, %cst_11 {dimension_numbers = #tpu.dot_dimension_numbers<[1], [0], [0], [1], [0, 0, 1, 1], [], []>} : vector<8x128xf32>, vector<128x128xf32>, vector<8x128xf32> -> vector<8x128xf32>
    %82 = vector.broadcast %64 : vector<1x128xf32> to vector<8x128xf32>
    %83 = arith.addf %81, %82 : vector<8x128xf32>
    %cst_12 = arith.constant 0.000000e+00 : f32
    %84 = vector.broadcast %cst_12 : f32 to vector<8x128xf32>
    %85 = arith.maximumf %83, %84 : vector<8x128xf32>
    %c256 = arith.constant 256 : index
    %c0_13 = arith.constant 0 : index
    %86 = vector.load %arg2[%c256, %c0_13] : memref<392x128xf32, #tpu.memory_space<vmem>>, vector<128x128xf32>
    %cst_14 = arith.constant dense<0.000000e+00> : vector<8x128xf32>
    %87 = tpu.matmul %85, %86, %cst_14 {dimension_numbers = #tpu.dot_dimension_numbers<[1], [0], [0], [1], [0, 0, 1, 1], [], []>} : vector<8x128xf32>, vector<128x128xf32>, vector<8x128xf32> -> vector<8x128xf32>
    %88 = vector.broadcast %65 : vector<1x128xf32> to vector<8x128xf32>
    %89 = arith.addf %87, %88 : vector<8x128xf32>
    %90 = vector.broadcast %75 : vector<8x1xf32> to vector<8x128xf32>
    %91 = arith.addf %89, %90 : vector<8x128xf32>
    %c0_15 = arith.constant 0 : index
    %c0_16 = arith.constant 0 : index
    %92 = vector.load %arg3[%c0_15, %c0_16] : memref<8x128xf32, #tpu.memory_space<vmem>>, vector<8x128xf32>
    tpu.vector_store %arg3[%c0_15, %c0_16], %91 {strides = array<i32>} : memref<8x128xf32, #tpu.memory_space<vmem>>, vector<8x128xf32>,
    return
  }
  func.func @transform_0(%arg0: i32) -> (i32, i32) {
    %c0_i32 = arith.constant 0 : i32
    %c0_i32_0 = arith.constant 0 : i32
    return %arg0, %c0_i32 : i32, i32
  }
  func.func @transform_1(%arg0: i32) -> (i32, i32) {
    %c0_i32 = arith.constant 0 : i32
    %c0_i32_0 = arith.constant 0 : i32
    %c0_i32_1 = arith.constant 0 : i32
    return %c0_i32, %c0_i32_0 : i32, i32
  }
  func.func @transform_2(%arg0: i32) -> (i32, i32) {
    %c0_i32 = arith.constant 0 : i32
    %c0_i32_0 = arith.constant 0 : i32
    return %arg0, %c0_i32 : i32, i32
  }
}

</mosaic_0001>

<bundles_post_ra>
// kernel: tpu_custom_call.1
= control target key start
LH: loop header
LB: loop body
LE: loop exit
PB: predicated region body
PF: predicated region fallthrough
CT: control target
= control target key end

     0   :  { %7 = vsyncpa [#allocation3], 0  ;;  %s850_s0 = inlined_call_operand.hbm [shape: f32[8,8], index: 0, kind: input, shape index: {}]   ;;  %s851_s1 = inlined_call_operand.hbm [shape: f32[392,128], index: 1, kind: input, shape index: {}]   ;;  %s852_s2 = inlined_call_operand.hbm [shape: f32[8,128], index: 2, kind: output, shape index: {}]  }
   0x1   :  { %8 = vsyncpa [#allocation6], 0 }
   0x2   :  { %9 = vsyncpa [#allocation4], 0  ;;  %s735_s9 = smov [#allocation2]   ;;  %s736_s11 = smov [#allocation5]  }
   0x3   :  { %s16_s10 = sshll.u32 %s735_s9, 4  ;;  %s25_s12 = sshll.u32 %s736_s11, 4  ;;  %s17_s10 = int_to_ptr.vmem [resolvable:$true] %s16_s10  ;;  %s766_s12 = int_to_ptr.vmem [resolvable:$true] %s25_s12 }
   0x4   :  { %s663_s15 = scalar_lea.hbm %s850_s0, 128 }
   0x5   :  { %p664_p0 = scmp.ne.s32.totalorder %s850_s0, %s663_s15  ;;  %p667_p1 = scmp.lt.u32.totalorder %s663_s15, %s850_s0 }
   0x7   :  { %p669_p2 = pnand %p667_p1, %p664_p0 }
   0x9   :  { %672 = shalt.err (!%p669_p2)
}
   0xa   :  { %s673_s20 = scalar_lea.vmem %s17_s10, 128  ;;  %p678_p4 = scmp.lt.s32.totalorder %s17_s10, %s17_s10 }
   0xb   :  { %p674_p3 = scmp.ne.s32.totalorder %s17_s10, %s673_s20  ;;  %p679_p5 = scmp.lt.s32.totalorder %s673_s20, %s673_s20 }
   0xd   :  { %p680_p6 = por %p679_p5, %p678_p4 }
   0xf   :  { %p681_p7 = pnand %p680_p6, %p674_p3 }
  0x11   :  { %684 = shalt.err (!%p681_p7)
}
  0x12   :  { %19 = dma.hbm_to_vmem [thread:$0]  %s850_s0, 128, %s17_s10, [#allocation3]  }
  0x13   :  { %s685_s25 = scalar_lea.hbm %s851_s1, 6272 }
  0x14   :  { %p686_p8 = scmp.ne.s32.totalorder %s851_s1, %s685_s25  ;;  %p689_p9 = scmp.lt.u32.totalorder %s685_s25, %s851_s1 }
  0x16   :  { %p691_p10 = pnand %p689_p9, %p686_p8 }
  0x18   :  { %694 = shalt.err (!%p691_p10)
}
  0x19   :  { %s695_s30 = scalar_lea.vmem %s766_s12, 6272  ;;  %p700_p12 = scmp.lt.s32.totalorder %s766_s12, %s766_s12 }
  0x1a   :  { %p696_p11 = scmp.ne.s32.totalorder %s766_s12, %s695_s30  ;;  %p701_p13 = scmp.lt.s32.totalorder %s695_s30, %s695_s30 }
  0x1c   :  { %p702_p0 = por %p701_p13, %p700_p12 }
  0x1e   :  { %p703_p1 = pnand %p702_p0, %p696_p11 }
  0x20   :  { %706 = shalt.err (!%p703_p1)
}
  0x21   :  { %s737_s0 = smov 128   ;;  %s738_s3 = smov 8  }
  0x22   :  { %31 = dma.hbm_to_vmem [thread:$0]  %s851_s1, 6272, %s766_s12, [#allocation6], %s737_s0, %s737_s0, %s738_s3  }
  0x23   :  { %729 = dma.done.wait [#allocation3], 128  }
  0x24   :  { %730 = vsyncadd [#allocation3], 4294967168 }
  0x25   :  { %731 = dma.done.wait [#allocation6], 6272  }
  0x26   :  { %732 = vsyncadd [#allocation6], 4294961024  ;;  %v739_v0 = vmov 6   ;;  %v740_v1 = vmov 4   ;;  %v741_v2 = vmov 0.0|0.0   ;;  %v38_v3 = vld [vmem:[#allocation2] sm:$0xff]  ;;  %v40_v58 = vlaneseq }
  0x27   :  { %656 = vset.pattern.permute.xlu1 %v739_v0  ;;  %654 = vset.pattern.permute.xlu0 %v740_v1  ;;  %v98_v4 = vld [vmem:[#allocation5] sm:$0xff]  ;;  %v99_v5 = vld [vmem:[#allocation5 + $0x8] sm:$0xff]  ;;  %v636_v6 = vtrunc.f32 %v38_v3  ;;  %v100_v8 = vld [vmem:[#allocation5 + $0x10] sm:$0xff]  ;;  %v742_v15 = vmov 7   ;;  %v743_v16 = vmov 5   ;;  %v744_v22 = vmov 0  }
  0x28   :  { %564 = vmatprep.subr.bf16.mxu0 %v741_v2  ;;  %588 = vmatprep.subr.bf16.mxu1 %v741_v2  ;;  %v565_v7 = vpack.c.bf16 %v99_v5, %v98_v4  ;;  %v101_v9 = vld [vmem:[#allocation5 + $0x18] sm:$0xff]  ;;  %v102_v12 = vld [vmem:[#allocation5 + $0x20] sm:$0xff]  ;;  %v103_v13 = vld [vmem:[#allocation5 + $0x28] sm:$0xff]  ;;  %v745_v23 = vmov 1   ;;  %v746_v27 = vmov 2   ;;  %v747_v28 = vmov 3  }
  0x29   :  { %v637_v10 = vcvt.f32.s32 %v636_v6  ;;  %v568_v11 = vpack.c.bf16 %v101_v9, %v100_v8  ;;  %v571_v14 = vpack.c.bf16 %v103_v13, %v102_v12  ;;  %v104_v17 = vld [vmem:[#allocation5 + $0x30] sm:$0xff]  ;;  %v105_v18 = vld [vmem:[#allocation5 + $0x38] sm:$0xff]  ;;  %v106_v20 = vld [vmem:[#allocation5 + $0x40] sm:$0xff]  ;;  %vm748_vm0 = vmmov 0   ;;  %s750_s1 = smov [#allocation7]  }
  0x2a   :  { %566 = vmatpush3.bf16.msra.mxu0 %v565_v7  ;;  %v574_v19 = vpack.c.bf16 %v105_v18, %v104_v17  ;;  %v107_v21 = vld [vmem:[#allocation5 + $0x48] sm:$0xff]  ;;  %v108_v25 = vld [vmem:[#allocation5 + $0x50] sm:$0xff]  ;;  %v109_v26 = vld [vmem:[#allocation5 + $0x58] sm:$0xff]  ;;  %v749_v35 = vmov 0.0   ;;  %v41_v61 = vand.u32 127, %v40_v58  ;;  %s394_s6 = sshll.u32 %s750_s1, 4  ;;  %s395_s6 = int_to_ptr.vmem [resolvable:$true] %s394_s6 }
  0x2b   :  { %567 = vmatprep.subr.bf16.mxu0 %v741_v2  ;;  %56 = vperm.xlu1 %656, %v637_v10   ;;  %v577_v24 = vpack.c.bf16 %v107_v21, %v106_v20  ;;  %v580_v29 = vpack.c.bf16 %v109_v26, %v108_v25  ;;  %v110_v30 = vld [vmem:[#allocation5 + $0x60] sm:$0xff]  ;;  %v111_v31 = vld [vmem:[#allocation5 + $0x68] sm:$0xff]  ;;  %v112_v33 = vld [vmem:[#allocation5 + $0x70] sm:$0xff]  ;;  %s707_s7 = scalar_lea.vmem %s395_s6, 128  ;;  %p712_p3 = scmp.lt.s32.totalorder %s395_s6, %s395_s6 }
  0x2c   :  { %43 = vperm.xlu0 %654, %v637_v10   ;;  %v583_v32 = vpack.c.bf16 %v111_v31, %v110_v30  ;;  %v113_v34 = vld [vmem:[#allocation5 + $0x78] sm:$0xff]  ;;  %491 = vmatprep.mubr.msk.f32.mxu0 %vm748_vm0, %v749_v35  ;;  %v205_v37 = vld [vmem:[#allocation5 + $0x80] sm:$0xff]  ;;  %v206_v38 = vld [vmem:[#allocation5 + $0x88] sm:$0xff]  ;;  %vm69_vm5 = vcmp.eq.s32.totalorder %v41_v61, 124  ;;  %vm77_vm6 = vcmp.eq.s32.totalorder %v41_v61, 125  ;;  %vm84_vm7 = vcmp.eq.s32.totalorder %v41_v61, 126  ;;  %p708_p2 = scmp.ne.s32.totalorder %s395_s6, %s707_s7  ;;  %p713_p4 = scmp.lt.s32.totalorder %s707_s7, %s707_s7 }
  0x2d   :  { %526 = vmatprep.mubr.msk.f32.mxu1 %vm748_vm0, %v749_v35  ;;  %v586_v36 = vpack.c.bf16 %v113_v34, %v112_v33  ;;  %v207_v39 = vld [vmem:[#allocation5 + $0x90] sm:$0xff]  ;;  %v589_v40 = vpack.c.bf16 %v206_v38, %v205_v37  ;;  %v208_v41 = vld [vmem:[#allocation5 + $0x98] sm:$0xff]  ;;  %v209_v43 = vld [vmem:[#allocation5 + $0xa0] sm:$0xff]  ;;  %vm91_vm8 = vcmp.eq.s32.totalorder %v41_v61, 127 }
  0x2e   :  { %569 = vmatpush3.bf16.msra.mxu0 %v568_v11  ;;  %v592_v42 = vpack.c.bf16 %v208_v41, %v207_v39  ;;  %v210_v44 = vld [vmem:[#allocation5 + $0xa8] sm:$0xff]  ;;  %v211_v46 = vld [vmem:[#allocation5 + $0xb0] sm:$0xff]  ;;  %v212_v47 = vld [vmem:[#allocation5 + $0xb8] sm:$0xff]  ;;  %p714_p5 = por %p713_p4, %p712_p3 }
  0x2f   :  { %570 = vmatprep.subr.bf16.mxu0 %v741_v2  ;;  %657 = vset.pattern.permute.xlu1 %v742_v15  ;;  %v595_v45 = vpack.c.bf16 %v210_v44, %v209_v43  ;;  %v598_v48 = vpack.c.bf16 %v212_v47, %v211_v46  ;;  %v213_v49 = vld [vmem:[#allocation5 + $0xc0] sm:$0xff]  ;;  %v214_v50 = vld [vmem:[#allocation5 + $0xc8] sm:$0xff]  ;;  %v215_v52 = vld [vmem:[#allocation5 + $0xd0] sm:$0xff] }
  0x30   :  { %655 = vset.pattern.permute.xlu0 %v743_v16  ;;  %63 = vperm.xlu1 %657, %v637_v10   ;;  %v601_v51 = vpack.c.bf16 %v214_v50, %v213_v49  ;;  %v216_v53 = vld [vmem:[#allocation5 + $0xd8] sm:$0xff]  ;;  %v217_v55 = vld [vmem:[#allocation5 + $0xe0] sm:$0xff]  ;;  %v218_v56 = vld [vmem:[#allocation5 + $0xe8] sm:$0xff]  ;;  %p715_p6 = pnand %p714_p5, %p708_p2 }
  0x31   :  { %49 = vperm.xlu0 %655, %v637_v10   ;;  %590 = vmatpush3.bf16.msra.mxu1 %v589_v40  ;;  %v604_v54 = vpack.c.bf16 %v216_v53, %v215_v52  ;;  %v607_v57 = vpack.c.bf16 %v218_v56, %v217_v55  ;;  %v219_v20 = vld [vmem:[#allocation5 + $0xf0] sm:$0xff]  ;;  %v220_v21 = vld [vmem:[#allocation5 + $0xf8] sm:$0xff]  ;;  %v184_v26 = vld [vmem:[#allocation5 + $0x180] sm:$0xff] }
  0x32   :  { %572 = vmatpush3.bf16.msra.mxu0 %v571_v14  ;;  %591 = vmatprep.subr.bf16.mxu1 %v741_v2  ;;  %v296_v39 = vld [vmem:[#allocation5 + $0x100] sm:$0xff]  ;;  %v297_v40 = vld [vmem:[#allocation5 + $0x108] sm:$0xff]  ;;  %v298_v41 = vld [vmem:[#allocation5 + $0x110] sm:$0xff] }
  0x33   :  { %573 = vmatprep.subr.bf16.mxu0 %v741_v2  ;;  %v299_v43 = vld [vmem:[#allocation5 + $0x118] sm:$0xff]  ;;  %v301_v46 = vld [vmem:[#allocation5 + $0x128] sm:$0xff] }
  0x34   :  { %658 = vset.pattern.permute.xlu1 %v744_v22  ;;  %v610_v22 = vpack.c.bf16 %v220_v21, %v219_v20  ;;  %v616_v44 = vpack.c.bf16 %v299_v43, %v298_v41  ;;  %v303_v49 = vld [vmem:[#allocation5 + $0x138] sm:$0xff]  ;;  %v305_v52 = vld [vmem:[#allocation5 + $0x148] sm:$0xff] }
  0x35   :  { %659 = vset.pattern.permute.xlu0 %v745_v23  ;;  %72 = vperm.xlu1 %658, %v38_v3   ;;  %v824_v23 = vshrl.u32 %v40_v58, 7  ;;  %v307_v55 = vld [vmem:[#allocation5 + $0x158] sm:$0xff]  ;;  %v309_v58 = vld [vmem:[#allocation5 + $0x168] sm:$0xff] }
  0x36   :  { %79 = vperm.xlu0 %659, %v38_v3   ;;  %575 = vmatpush3.bf16.msra.mxu0 %v574_v19 }
  0x37   :  { %576 = vmatprep.subr.bf16.mxu0 %v741_v2  ;;  %593 = vmatpush3.bf16.msra.mxu1 %v592_v42  ;;  %v187_v25 = vsub.s32 3, %v824_v23  ;;  %v613_v42 = vpack.c.bf16 %v297_v40, %v296_v39 }
  0x38   :  { %594 = vmatprep.subr.bf16.mxu1 %v741_v2 }
  0x39   :  { %660 = vset.pattern.permute.xlu1 %v746_v27  ;;  %v193_v27 = vsub.s32 4, %v824_v23 }
  0x3a   :  { %662 = vset.pattern.permute.xlu0 %v747_v28  ;;  %86 = vperm.xlu1 %660, %v38_v3  }
  0x3b   :  { %578 = vmatpush3.bf16.msra.mxu0 %v577_v24  ;;  %596 = vmatpush3.bf16.msra.mxu1 %v595_v45  ;;  %v201_v24 = vsub.s32 0, %v824_v23  ;;  %v194_v30 = vrot.slane %v184_v26, %v193_v27  ;;  %v300_v45 = vld [vmem:[#allocation5 + $0x120] sm:$0xff] }
  0x3c   :  { %579 = vmatprep.subr.bf16.mxu0 %v741_v2  ;;  %597 = vmatprep.subr.bf16.mxu1 %v741_v2  ;;  %v619_v47 = vpack.c.bf16 %v301_v46, %v300_v45 }
  0x3e   :  { %661 = vset.pattern.permute.xlu1 %v747_v28  ;;  %v202_v28 = vrot.slane %v184_v26, %v201_v24 }
  0x3f   :  { %581 = vmatpush3.bf16.msra.mxu0 %v580_v29  ;;  %93 = vperm.xlu1 %661, %v38_v3   ;;  %v188_v29 = vrot.slane %v184_v26, %v187_v25 }
  0x40   :  { %582 = vmatprep.subr.bf16.mxu0 %v741_v2  ;;  %599 = vmatpush3.bf16.msra.mxu1 %v598_v48  ;;  %v302_v48 = vld [vmem:[#allocation5 + $0x130] sm:$0xff] }
  0x41   :  { %600 = vmatprep.subr.bf16.mxu1 %v741_v2  ;;  %v622_v50 = vpack.c.bf16 %v303_v49, %v302_v48 }
  0x43   :  { %584 = vmatpush3.bf16.msra.mxu0 %v583_v32 }
  0x44   :  { %585 = vmatprep.subr.bf16.mxu0 %v741_v2  ;;  %602 = vmatpush3.bf16.msra.mxu1 %v601_v51  ;;  %v304_v51 = vld [vmem:[#allocation5 + $0x140] sm:$0xff] }
  0x45   :  { %603 = vmatprep.subr.bf16.mxu1 %v741_v2  ;;  %v625_v53 = vpack.c.bf16 %v305_v52, %v304_v51 }
  0x47   :  { %587 = vmatpush3.bf16.msra.mxu0 %v586_v36 }
  0x48   :  { %612 = vmatprep.subr.bf16.mxu0 %v741_v2  ;;  %605 = vmatpush3.bf16.msra.mxu1 %v604_v54  ;;  %v306_v54 = vld [vmem:[#allocation5 + $0x150] sm:$0xff] }
  0x49   :  { %606 = vmatprep.subr.bf16.mxu1 %v741_v2  ;;  %v628_v56 = vpack.c.bf16 %v307_v55, %v306_v54 }
  0x4c   :  { %608 = vmatpush3.bf16.msra.mxu1 %v607_v57  ;;  %v308_v57 = vld [vmem:[#allocation5 + $0x160] sm:$0xff] }
  0x4d   :  { %609 = vmatprep.subr.bf16.mxu1 %v741_v2 }
  0x50   :  { %611 = vmatpush3.bf16.msra.mxu1 %v610_v22 }
  0xaa   :  { %v57_v59 = vpop.permute.xlu1 %56 }
  0xab   :  { %v44_v60 = vpop.permute.xlu0 %43  ;;  %vm58_vm2 = vcmp.eq.s32.totalorder %v41_v61, %v57_v59  ;;  %v631_v59 = vpack.c.bf16 %v309_v58, %v308_v57 }
  0xac   :  { %vm45_vm1 = vcmp.eq.s32.totalorder %v41_v61, %v44_v60  ;;  %v406_v4 = vsel %vm58_vm2, 1.0, %v749_v35  ;;  %v310_v60 = vld [vmem:[#allocation5 + $0x170] sm:$0xff] }
  0xad   :  { %v404_v0 = vsel %vm45_vm1, 1.0, %v749_v35 }
  0xaf   :  { %v64_v62 = vpop.permute.xlu1 %63 }
  0xb0   :  { %v50_v63 = vpop.permute.xlu0 %49  ;;  %vm65_vm4 = vcmp.eq.s32.totalorder %v41_v61, %v64_v62 }
  0xb1   :  { %vm51_vm3 = vcmp.eq.s32.totalorder %v41_v61, %v50_v63  ;;  %v407_v8 = vsel %vm65_vm4, 1.0, %v749_v35  ;;  %v311_v61 = vld [vmem:[#allocation5 + $0x178] sm:$0xff]  ;;  %v223_v63 = vsub.s32 1, %v824_v23 }
  0xb2   :  { %v405_v1 = vsel %vm51_vm3, 1.0, %v749_v35  ;;  %v634_v62 = vpack.c.bf16 %v311_v61, %v310_v60 }
  0xb3   :  { %v54_v3 = vadd.f32 %v405_v1, %v404_v0  ;;  %v224_v0 = vrot.slane %v184_v26, %v223_v63 }
  0xb4   :  { %v73_v6 = vpop.permute.xlu1 %72 }
  0xb5   :  { %v61_v5 = vadd.f32 %v406_v4, %v54_v3  ;;  %v80_v7 = vpop.permute.xlu0 %79  ;;  %v75_v10 = vsel %vm69_vm5, %v73_v6, 0.0  ;;  %v314_v6 = vsub.s32 2, %v824_v23 }
  0xb6   :  { %v82_v11 = vsel %vm77_vm6, %v80_v7, 0.0 }
  0xb7   :  { %v68_v9 = vadd.f32 %v407_v8, %v61_v5  ;;  %v315_v7 = vrot.slane %v184_v26, %v314_v6 }
  0xb9   :  { %v76_v12 = vadd.f32 %v75_v10, %v68_v9  ;;  %v87_v13 = vpop.permute.xlu1 %86 }
  0xba   :  { %v89_v15 = vsel %vm84_vm7, %v87_v13, 0.0 }
  0xbb   :  { %v83_v14 = vadd.f32 %v82_v11, %v76_v12 }
  0xbd   :  { %v90_v16 = vadd.f32 %v89_v15, %v83_v14 }
  0xbe   :  { %v94_v17 = vpop.permute.xlu1 %93 }
  0xbf   :  { %v96_v18 = vsel %vm91_vm8, %v94_v17, 0.0 }
  0xc0   :  { %v97_v19 = vadd.f32 %v96_v18, %v90_v16 }
  0xc2   :  { %492 = vmatmul.mubr.f32.vlgmr.msra.gmra.mrb[0].mxu0 %v97_v19 }
  0xc3   :  { %561 = vmatprep.mubr.msk.f32.mxu0 %vm748_vm0, %v749_v35  ;;  %614 = vmatpush3.bf16.msra.mxu0 %v613_v42 }
  0xc4   :  { %615 = vmatprep.subr.bf16.mxu0 %v741_v2 }
  0xc7   :  { %617 = vmatpush3.bf16.msra.mxu0 %v616_v44 }
  0xc8   :  { %618 = vmatprep.subr.bf16.mxu0 %v741_v2 }
  0xcb   :  { %620 = vmatpush3.bf16.msra.mxu0 %v619_v47 }
  0xcc   :  { %621 = vmatprep.subr.bf16.mxu0 %v741_v2 }
  0xcf   :  { %623 = vmatpush3.bf16.msra.mxu0 %v622_v50 }
  0xd0   :  { %624 = vmatprep.subr.bf16.mxu0 %v741_v2 }
  0xd3   :  { %626 = vmatpush3.bf16.msra.mxu0 %v625_v53 }
  0xd4   :  { %627 = vmatprep.subr.bf16.mxu0 %v741_v2 }
  0xd7   :  { %629 = vmatpush3.bf16.msra.mxu0 %v628_v56 }
  0xd8   :  { %630 = vmatprep.subr.bf16.mxu0 %v741_v2 }
  0xdb   :  { %632 = vmatpush3.bf16.msra.mxu0 %v631_v59 }
  0xdc   :  { %633 = vmatprep.subr.bf16.mxu0 %v741_v2 }
  0xdf   :  { %635 = vmatpush3.bf16.msra.mxu0 %v634_v62 }
 0x195   :  { %v180_v31 = vpop.f32.mrb[0].mxu0 }
 0x196   :  { %v493_v32 = vpop.f32.mrb[1].mxu0  ;;  %v203_v33 = vadd.f32 %v202_v28, %v180_v31  ;;  %v189_v34 = vmul.f32 %v188_v29, %v180_v31  ;;  %v195_v37 = vmul.f32 %v194_v30, %v180_v31 }
 0x198   :  { %v204_v35 = vmax.f32 %v203_v33, 0.0  ;;  %v190_v36 = vmul.f32 %v189_v34, %v180_v31 }
 0x19a   :  { %527 = vmatmul.mubr.f32.vlgmr.msra.gmra.mrb[0].mxu1 %v204_v35  ;;  %v196_v38 = vadd.f32 %v195_v37, %v190_v36 }
 0x19c   :  { %197 = vadd.xlane.f32.xlu0 %v196_v38 }
 0x229   :  { %v198_v10 = vpop.xlane.xlu0 %197 }
 0x26d   :  { %v291_v1 = vpop.f32.mrb[0].mxu1 }
 0x26e   :  { %v292_v3 = vadd.f32 %v291_v1, %v224_v0  ;;  %v528_v4 = vpop.f32.mrb[1].mxu1 }
 0x270   :  { %v295_v5 = vmax.f32 %v292_v3, 0.0 }
 0x272   :  { %562 = vmatmul.mubr.f32.vlgmr.msra.gmra.mrb[2].mxu0 %v295_v5 }
 0x345   :  { %v382_v8 = vpop.f32.mrb[2].mxu0 }
 0x346   :  { %v383_v9 = vadd.f32 %v382_v8, %v315_v7  ;;  %v563_v2 = vpop.f32.mrb[3].mxu0 }
 0x348   :  { %v386_v11 = vadd.f32 %v383_v9, %v198_v10 }
 0x34a   :  { %387 = vst [vmem:[#allocation7] sm:$0xff] %v386_v11 }
 0x34b   :  { %718 = shalt.err (!%p715_p6)
}
 0x34c   :  { %s719_s10 = scalar_lea.hbm %s852_s2, 128 }
 0x34d   :  { %p720_p7 = scmp.ne.s32.totalorder %s852_s2, %s719_s10  ;;  %p723_p8 = scmp.lt.u32.totalorder %s719_s10, %s852_s2 }
 0x34f   :  { %p725_p9 = pnand %p723_p8, %p720_p7 }
 0x351   :  { %728 = shalt.err (!%p725_p9)
}
 0x352   :  { %397 = dma.vmem_to_hbm [thread:$0]  %s395_s6, 128, %s852_s2, [#allocation4]  }
 0x353   :  { %733 = dma.done.wait [#allocation4], 128  }
 0x354   :  { %734 = vsyncadd [#allocation4], 4294967168 }
 0x355   :  { %401 = vsyncpa [#allocation3], 1 }
 0x356   :  { %402 = vsyncpa [#allocation6], 1 }
 0x357   :  { %403 = vsyncpa [#allocation4], 1 }

</bundles_post_ra>
